<compile_context>
chip_gen: v7x
topology: tpu7x:2x2x1
jax: 0.10.0
libtpu: 0.0.40
codegen_flags: <defaults>
</compile_context>

<pallas_src>
import functools

import jax
import jax.numpy as jnp
from jax.experimental import pallas as pl
from jax.experimental.pallas import tpu as pltpu


def round_up(x, m):
    return (x + m - 1) // m * m


# ----------------------------------------------------------------------------
# Generic tiled (matmul + bias) kernel.  Used for:
#   * hoisted LSTM input projection: gates_x = x @ W_ih^T + (b_ih + b_hh)
#   * hidden2tag output projection :     tag = y @ W^T    + b
# Operands bf16 (MXU), f32 accumulation / bias / output.
# ----------------------------------------------------------------------------
def _linear_kernel(x_ref, w_ref, b_ref, o_ref):
    o_ref[...] = (
        jnp.dot(x_ref[...], w_ref[...], preferred_element_type=jnp.float32)
        + b_ref[...])


def linear_bias(x2d, w, b):
    """x2d: (M, K) f32 ; w: (K, N) bf16 (pre-transposed/padded, N % 128 == 0) ;
    b: (1, N) f32.  Returns (M, N) f32."""
    M, K = x2d.shape
    N = w.shape[1]

    row_blk = min(256, round_up(M, 16))          # 16-aligned sublanes for bf16 input
    col_blk = min(512, N)                        # lane-dense output tiles
    Mp = round_up(M, row_blk)
    Np = round_up(N, col_blk)

    xb = x2d.astype(jnp.bfloat16)
    if Mp != M:
        xb = jnp.pad(xb, ((0, Mp - M), (0, 0)))
    wp = w if Np == N else jnp.pad(w, ((0, 0), (0, Np - N)))
    bp = b if Np == N else jnp.pad(b, ((0, 0), (0, Np - N)))

    out = pl.pallas_call(
        _linear_kernel,
        out_shape=jax.ShapeDtypeStruct((Mp, Np), jnp.float32),
        grid=(Mp // row_blk, Np // col_blk),
        in_specs=[
            pl.BlockSpec((row_blk, K), lambda i, j: (i, 0)),
            pl.BlockSpec((K, col_blk), lambda i, j: (0, j)),
            pl.BlockSpec((1, col_blk), lambda i, j: (0, j)),
        ],
        out_specs=pl.BlockSpec((row_blk, col_blk), lambda i, j: (i, j)),
        compiler_params=pltpu.CompilerParams(
            dimension_semantics=("parallel", "parallel"),
            vmem_limit_bytes=64 * 1024 * 1024),
    )(xb, wp, bp)
    return out[:M, :N]


# ----------------------------------------------------------------------------
# LSTM recurrence kernel: T_BLK timesteps per grid step, h/c in VMEM scratch.
# gates_x already contains x @ W_ih^T + (b_ih + b_hh), so the serial body is a
# single (Bp, Hp) x (Hp, 4Hp) matmul plus gate elementwise per timestep.
# ----------------------------------------------------------------------------
def _lstm_rec_kernel(gx_ref, whh_ref, h0_ref, c0_ref, y_ref, cN_ref,
                     h_sc, c_sc, *, t_blk, last_j, Hp):
    g = pl.program_id(0)

    @pl.when(g == 0)
    def _():
        h_sc[...] = h0_ref[...]
        c_sc[...] = c0_ref[...]

    h = h_sc[...]                      # (Bp, Hp) f32 state
    c = c_sc[...]
    whh = whh_ref[...]                 # (Hp, 4Hp) bf16

    for j in range(t_blk):             # fully unrolled inner time loop
        gates = gx_ref[j] + jnp.dot(h.astype(jnp.bfloat16), whh,
                                    preferred_element_type=jnp.float32)
        # PyTorch gate order (i, f, g, o); slices are 128-lane aligned (Hp % 128 == 0).
        i_g = jax.nn.sigmoid(gates[:, 0 * Hp:1 * Hp])
        f_g = jax.nn.sigmoid(gates[:, 1 * Hp:2 * Hp])
        g_g = jnp.tanh(gates[:, 2 * Hp:3 * Hp])
        o_g = jax.nn.sigmoid(gates[:, 3 * Hp:4 * Hp])
        c = f_g * c + i_g * g_g
        h = o_g * jnp.tanh(c)
        y_ref[j] = h
        if j == last_j:                # capture c_n at the true final timestep T-1
            @pl.when(g == pl.num_programs(0) - 1)
            def _(c_last=c):
                cN_ref[...] = c_last

    h_sc[...] = h
    c_sc[...] = c


def lstm_recurrence(gates_x, w_hh_t, h0, c0, *, t_blk=16):
    """gates_x: (T, Bp, 4Hp) f32 ; w_hh_t: (Hp, 4Hp) bf16 ; h0/c0: (Bp, Hp) f32.
    Returns (y: (T, Bp, Hp) f32, c_n: (Bp, Hp) f32)."""
    T, Bp, G = gates_x.shape
    Hp = G // 4
    t_blk = min(t_blk, T)
    Tp = round_up(T, t_blk)
    if Tp != T:
        # zero-pad extra timesteps; they run after c_n is captured and their y rows
        # are sliced off below, so they never affect valid results.
        gates_x = jnp.pad(gates_x, ((0, Tp - T), (0, 0), (0, 0)))
    last_j = (T - 1) % t_blk

    y, c_n = pl.pallas_call(
        functools.partial(_lstm_rec_kernel, t_blk=t_blk, last_j=last_j, Hp=Hp),
        out_shape=(
            jax.ShapeDtypeStruct((Tp, Bp, Hp), jnp.float32),
            jax.ShapeDtypeStruct((Bp, Hp), jnp.float32),
        ),
        grid_spec=pltpu.PrefetchScalarGridSpec(
            num_scalar_prefetch=0,
            grid=(Tp // t_blk,),
            in_specs=[
                pl.BlockSpec((t_blk, Bp, 4 * Hp), lambda g: (g, 0, 0)),  # gates_x blk
                pl.BlockSpec((Hp, 4 * Hp), lambda g: (0, 0)),            # W_hh^T
                pl.BlockSpec((Bp, Hp), lambda g: (0, 0)),                # h0
                pl.BlockSpec((Bp, Hp), lambda g: (0, 0)),                # c0
            ],
            out_specs=[
                pl.BlockSpec((t_blk, Bp, Hp), lambda g: (g, 0, 0)),      # y blk
                pl.BlockSpec((Bp, Hp), lambda g: (0, 0)),                # c_n
            ],
            scratch_shapes=[
                pltpu.VMEM((Bp, Hp), jnp.float32),                       # h carry
                pltpu.VMEM((Bp, Hp), jnp.float32),                       # c carry
            ],
        ),
        compiler_params=pltpu.CompilerParams(
            dimension_semantics=("arbitrary",),                          # recurrence
            vmem_limit_bytes=64 * 1024 * 1024),
    )(gates_x, w_hh_t, h0, c0)
    return y[:T], c_n


# ----------------------------------------------------------------------------
# Parameters: raw PyTorch-layout init + one-time padded/transposed/cast prep
# ----------------------------------------------------------------------------
def init_params(key, vocab_size, emsize, nhid, nlayers):
    initrange = 0.1
    ks = jax.random.split(key, 2 + 4 * nlayers)
    params = {
        "embedding": jax.random.uniform(
            ks[0], (vocab_size, emsize), jnp.float32, -initrange, initrange),
        "h2t_w": jax.random.uniform(
            ks[1], (vocab_size, nhid), jnp.float32, -initrange, initrange),
        "h2t_b": jnp.zeros((vocab_size,), jnp.float32),
        "lstm": [],
    }
    stdv = 1.0 / (nhid ** 0.5)
    for l in range(nlayers):
        in_size = emsize if l == 0 else nhid
        k0, k1, k2, k3 = ks[2 + 4 * l: 2 + 4 * (l + 1)]
        params["lstm"].append({
            "w_ih": jax.random.uniform(k0, (4 * nhid, in_size), jnp.float32, -stdv, stdv),
            "w_hh": jax.random.uniform(k1, (4 * nhid, nhid), jnp.float32, -stdv, stdv),
            "b_ih": jax.random.uniform(k2, (4 * nhid,), jnp.float32, -stdv, stdv),
            "b_hh": jax.random.uniform(k3, (4 * nhid,), jnp.float32, -stdv, stdv),
        })
    return params


def prepare_params(raw, emsize, nhid):
    """One-time transposes / per-gate padding / bf16 casts (hoisted out of forward)."""
    H = nhid
    Hp = round_up(H, 128)
    V = raw["h2t_w"].shape[0]
    Vp = round_up(V, 128)

    prep = {"embedding": raw["embedding"], "H": H, "Hp": Hp, "V": V, "Vp": Vp}

    # hidden2tag: (V, H) -> (Hp, Vp) bf16, bias -> (1, Vp) f32  (zero padding)
    w = jnp.transpose(raw["h2t_w"])                                   # (H, V)
    prep["h2t_w"] = jnp.pad(w, ((0, Hp - H), (0, Vp - V))).astype(jnp.bfloat16)
    prep["h2t_b"] = jnp.pad(raw["h2t_b"], (0, Vp - V)).reshape(1, Vp).astype(jnp.float32)

    def pad_gate_rows(w4h):   # (4H, X) -> (4Hp, X), padding each gate block separately
        X = w4h.shape[1]
        return jnp.pad(w4h.reshape(4, H, X),
                       ((0, 0), (0, Hp - H), (0, 0))).reshape(4 * Hp, X)

    layers = []
    for l, lp in enumerate(raw["lstm"]):
        in_dim = lp["w_ih"].shape[1]
        in_p = in_dim if l == 0 else Hp       # layer 0 input is the embedding (E)
        wih = pad_gate_rows(lp["w_ih"])                               # (4Hp, in_dim)
        wih = jnp.pad(wih, ((0, 0), (0, in_p - in_dim)))              # (4Hp, in_p)
        whh = pad_gate_rows(lp["w_hh"])                               # (4Hp, H)
        whh = jnp.pad(whh, ((0, 0), (0, Hp - H)))                     # (4Hp, Hp)
        bias = jnp.pad((lp["b_ih"] + lp["b_hh"]).reshape(4, H),
                       ((0, 0), (0, Hp - H))).reshape(1, 4 * Hp)
        layers.append({
            "w_ih_t": jnp.transpose(wih).astype(jnp.bfloat16),        # (in_p, 4Hp)
            "w_hh_t": jnp.transpose(whh).astype(jnp.bfloat16),        # (Hp, 4Hp)
            "bias": bias.astype(jnp.float32),                         # (1, 4Hp)
        })
    prep["lstm"] = layers
    return prep


# ----------------------------------------------------------------------------
# Full model forward (dropout = identity in eval mode)
# ----------------------------------------------------------------------------
def rnn_model_forward(prep, x, hidden):
    """x: (T, B) int32 tokens; hidden = (h0, c0) each (nlayers, B, H)."""
    h0, c0 = hidden
    T, B = x.shape
    H, Hp, V, Vp = prep["H"], prep["Hp"], prep["V"], prep["Vp"]
    Bp = round_up(B, 8)

    emb = jnp.take(prep["embedding"], x, axis=0)              # (T, B, E) gather glue
    # TODO(synk): embedding gather + dropout(p) kept in plain JAX (dropout = identity).
    layer_in = jnp.pad(emb, ((0, 0), (0, Bp - B), (0, 0)))    # (T, Bp, E)

    h0p = jnp.pad(h0, ((0, 0), (0, Bp - B), (0, Hp - H)))
    c0p = jnp.pad(c0, ((0, 0), (0, Bp - B), (0, Hp - H)))

    h_list, c_list = [], []
    for l, lp in enumerate(prep["lstm"]):
        in_dim = layer_in.shape[-1]
        gates_x = linear_bias(layer_in.reshape(T * Bp, in_dim),
                              lp["w_ih_t"], lp["bias"])       # (T*Bp, 4Hp)
        gates_x = gates_x.reshape(T, Bp, 4 * Hp)
        y, c_n = lstm_recurrence(gates_x, lp["w_hh_t"], h0p[l], c0p[l])
        h_list.append(y[T - 1])                               # h_n == last output
        c_list.append(c_n)
        layer_in = y                                          # (T, Bp, Hp)

    tag = linear_bias(layer_in.reshape(T * Bp, Hp), prep["h2t_w"], prep["h2t_b"])
    tag = tag.reshape(T, Bp, Vp)[:, :B, :V]                   # drop batch/vocab padding

    h_n = jnp.stack(h_list, axis=0)[:, :B, :H]
    c_n = jnp.stack(c_list, axis=0)[:, :B, :H]
    return tag, (h_n, c_n)


if __name__ == "__main__":
    # small config consistent with the module
    vocab_size, emsize, nhid, nlayers = 50, 32, 32, 2
    T, B = 8, 2

    key = jax.random.PRNGKey(0)
    kp, kx = jax.random.split(key)
    raw = init_params(kp, vocab_size, emsize, nhid, nlayers)
    prep = prepare_params(raw, emsize, nhid)

    x = jax.random.randint(kx, (T, B), 0, vocab_size, dtype=jnp.int32)
    h0 = jnp.zeros((nlayers, B, nhid), jnp.float32)           # init_hidden()
    c0 = jnp.zeros((nlayers, B, nhid), jnp.float32)

    tag, (h_n, c_n) = rnn_model_forward(prep, x, (h0, c0))
    jax.block_until_ready((tag, h_n, c_n))

    assert tag.shape == (T, B, vocab_size)
    assert h_n.shape == (nlayers, B, nhid)
    assert c_n.shape == (nlayers, B, nhid)
    assert bool(jnp.all(jnp.isfinite(tag)))
    print("KERNEL_OK")
</pallas_src>

<mosaic_0001>
module attributes {stable_mosaic.version = 11 : i64} {
  func.func @_linear_kernel(%arg0: i32, %arg1: i32, %arg2: memref<64x32xbf16, #tpu.memory_space<vmem>>, %arg3: memref<32x512xbf16, #tpu.memory_space<vmem>>, %arg4: memref<1x512xf32, #tpu.memory_space<vmem>>, %arg5: memref<64x512xf32, #tpu.memory_space<vmem>>) attributes {dimension_semantics = [#tpu.dimension_semantics<parallel>, #tpu.dimension_semantics<parallel>], iteration_bounds = array<i64: 1, 1>, scalar_prefetch = 0 : i64, scratch_operands = 0 : i64, tpu.core_type = #tpu.core_type<tc>, window_params = [{transform_indices = @transform_0, window_bounds = array<i64: 64, 32>}, {transform_indices = @transform_1, window_bounds = array<i64: 32, 512>}, {transform_indices = @transform_2, window_bounds = array<i64: 1, 512>}, {transform_indices = @transform_3, window_bounds = array<i64: 64, 512>}]} {
    %c0 = arith.constant 0 : index
    %c0_0 = arith.constant 0 : index
    %0 = vector.load %arg2[%c0, %c0_0] : memref<64x32xbf16, #tpu.memory_space<vmem>>, vector<64x32xbf16>
    %c0_1 = arith.constant 0 : index
    %c0_2 = arith.constant 0 : index
    %1 = vector.load %arg3[%c0_1, %c0_2] : memref<32x512xbf16, #tpu.memory_space<vmem>>, vector<32x512xbf16>
    %cst = arith.constant dense<0.000000e+00> : vector<64x512xf32>
    %2 = tpu.matmul %0, %1, %cst {dimension_numbers = #tpu.dot_dimension_numbers<[1], [0], [0], [1], [0, 0, 1, 1], [], []>} : vector<64x32xbf16>, vector<32x512xbf16>, vector<64x512xf32> -> vector<64x512xf32>
    %c0_3 = arith.constant 0 : index
    %c0_4 = arith.constant 0 : index
    %3 = vector.load %arg4[%c0_3, %c0_4] : memref<1x512xf32, #tpu.memory_space<vmem>>, vector<1x512xf32>
    %4 = vector.broadcast %3 : vector<1x512xf32> to vector<64x512xf32>
    %5 = arith.addf %2, %4 : vector<64x512xf32>
    %c0_5 = arith.constant 0 : index
    %c0_6 = arith.constant 0 : index
    %6 = vector.load %arg5[%c0_5, %c0_6] : memref<64x512xf32, #tpu.memory_space<vmem>>, vector<64x512xf32>
    tpu.vector_store %arg5[%c0_5, %c0_6], %5 {strides = array<i32>} : memref<64x512xf32, #tpu.memory_space<vmem>>, vector<64x512xf32>,
    return
  }
  func.func @transform_0(%arg0: i32, %arg1: i32) -> (i32, i32) {
    %c0_i32 = arith.constant 0 : i32
    %c0_i32_0 = arith.constant 0 : i32
    return %arg0, %c0_i32 : i32, i32
  }
  func.func @transform_1(%arg0: i32, %arg1: i32) -> (i32, i32) {
    %c0_i32 = arith.constant 0 : i32
    %c0_i32_0 = arith.constant 0 : i32
    return %c0_i32, %arg1 : i32, i32
  }
  func.func @transform_2(%arg0: i32, %arg1: i32) -> (i32, i32) {
    %c0_i32 = arith.constant 0 : i32
    %c0_i32_0 = arith.constant 0 : i32
    return %c0_i32, %arg1 : i32, i32
  }
  func.func @transform_3(%arg0: i32, %arg1: i32) -> (i32, i32) {
    %c0_i32 = arith.constant 0 : i32
    return %arg0, %arg1 : i32, i32
  }
}

</mosaic_0001>

<bundles_post_ra>
// kernel: tpu_custom_call.1
= control target key start
LH: loop header
LB: loop body
LE: loop exit
PB: predicated region body
PF: predicated region fallthrough
CT: control target
= control target key end

     0   :  { %8 = vsyncpa [#allocation3], 0  ;;  %s630_s0 = inlined_call_operand.hbm [shape: bf16[64,32], index: 0, kind: input, shape index: {}]   ;;  %s631_s1 = inlined_call_operand.hbm [shape: bf16[32,512], index: 1, kind: input, shape index: {}]   ;;  %s632_s2 = inlined_call_operand.hbm [shape: f32[1,512], index: 2, kind: input, shape index: {}]   ;;  %s633_s3 = inlined_call_operand.hbm [shape: f32[64,512], index: 3, kind: output, shape index: {}]  }
   0x1   :  { %9 = vsyncpa [#allocation6], 0 }
   0x2   :  { %10 = vsyncpa [#allocation4], 0  ;;  %s503_s12 = smov [#allocation5]   ;;  %s409_s16 = scalar_lea.hbm %s631_s1, 1024 }
   0x3   :  { %s28_s13 = sshll.u32 %s503_s12, 4  ;;  %p410_p0 = scmp.ne.s32.totalorder %s631_s1, %s409_s16  ;;  %s29_s13 = int_to_ptr.vmem [resolvable:$true] %s28_s13 }
   0x4   :  { %p413_p1 = scmp.lt.u32.totalorder %s409_s16, %s631_s1 }
   0x6   :  { %p415_p2 = pnand %p413_p1, %p410_p0 }
   0x8   :  { %418 = shalt.err (!%p415_p2)
}
   0x9   :  { %s419_s21 = scalar_lea.vmem %s29_s13, 1024  ;;  %p424_p4 = scmp.lt.s32.totalorder %s29_s13, %s29_s13 }
   0xa   :  { %p420_p3 = scmp.ne.s32.totalorder %s29_s13, %s419_s21  ;;  %p425_p5 = scmp.lt.s32.totalorder %s419_s21, %s419_s21 }
   0xc   :  { %p426_p6 = por %p425_p5, %p424_p4 }
   0xe   :  { %p427_p7 = pnand %p426_p6, %p420_p3 }
  0x10   :  { %430 = shalt.err (!%p427_p7)
}
  0x11   :  { %s504_s22 = smov 256   ;;  %s505_s23 = smov 16  }
  0x12   :  { %34 = dma.hbm_to_vmem [thread:$0]  %s631_s1, 1024, %s29_s13, [#allocation6], %s504_s22, %s504_s22, %s505_s23  }
  0x13   :  { %s506_s26 = smov [#allocation2]   ;;  %s431_s30 = scalar_lea.hbm %s630_s0, 512 }
  0x14   :  { %s16_s27 = sshll.u32 %s506_s26, 4  ;;  %p432_p8 = scmp.ne.s32.totalorder %s630_s0, %s431_s30  ;;  %s17_s27 = int_to_ptr.vmem [resolvable:$true] %s16_s27 }
  0x15   :  { %p435_p9 = scmp.lt.u32.totalorder %s431_s30, %s630_s0 }
  0x17   :  { %p437_p10 = pnand %p435_p9, %p432_p8 }
  0x19   :  { %440 = shalt.err (!%p437_p10)
}
  0x1a   :  { %s441_s8 = scalar_lea.vmem %s17_s27, 512  ;;  %p446_p12 = scmp.lt.s32.totalorder %s17_s27, %s17_s27 }
  0x1b   :  { %p442_p11 = scmp.ne.s32.totalorder %s17_s27, %s441_s8  ;;  %p447_p13 = scmp.lt.s32.totalorder %s441_s8, %s441_s8 }
  0x1d   :  { %p448_p0 = por %p447_p13, %p446_p12 }
  0x1f   :  { %p449_p1 = pnand %p448_p0, %p442_p11 }
  0x21   :  { %452 = shalt.err (!%p449_p1)
}
  0x22   :  { %s507_s1 = smov 64   ;;  %s508_s9 = smov 4  }
  0x23   :  { %22 = dma.hbm_to_vmem [thread:$0]  %s630_s0, 512, %s17_s27, [#allocation3], %s507_s1, %s507_s1, %s508_s9  }
  0x24   :  { %s509_s12 = smov [#allocation7]   ;;  %s453_s16 = scalar_lea.hbm %s632_s2, 64 }
  0x25   :  { %s41_s13 = sshll.u32 %s509_s12, 4  ;;  %p454_p2 = scmp.ne.s32.totalorder %s632_s2, %s453_s16  ;;  %s42_s13 = int_to_ptr.vmem [resolvable:$true] %s41_s13 }
  0x26   :  { %p457_p3 = scmp.lt.u32.totalorder %s453_s16, %s632_s2 }
  0x28   :  { %p459_p4 = pnand %p457_p3, %p454_p2 }
  0x2a   :  { %462 = shalt.err (!%p459_p4)
}
  0x2b   :  { %s463_s21 = scalar_lea.vmem %s42_s13, 64  ;;  %p468_p6 = scmp.lt.s32.totalorder %s42_s13, %s42_s13 }
  0x2c   :  { %p464_p5 = scmp.ne.s32.totalorder %s42_s13, %s463_s21  ;;  %p469_p7 = scmp.lt.s32.totalorder %s463_s21, %s463_s21 }
  0x2e   :  { %p470_p8 = por %p469_p7, %p468_p6 }
  0x30   :  { %p471_p9 = pnand %p470_p8, %p464_p5 }
  0x32   :  { %474 = shalt.err (!%p471_p9)
}
  0x33   :  { %44 = dma.hbm_to_vmem [thread:$0]  %s632_s2, 64, %s42_s13, [#allocation6]  }
  0x34   :  { %497 = dma.done.wait [#allocation3], 512  }
  0x35   :  { %498 = vsyncadd [#allocation3], 4294966784 }
  0x36   :  { %499 = dma.done.wait [#allocation6], 1088  }
  0x37   :  { %500 = vsyncadd [#allocation6], 4294966208  ;;  %v510_v0 = vmov 0   ;;  %v393_v1 = vld [vmem:[#allocation5 + $0x4] ss:$16 sps:$4 sm:$0xff]   ;;  %vm153_vm0 = vcmask 261120   ;;  %v73_v13 = vlaneseq }
  0x38   :  { %198 = vmatprep.mubr.bf16.mxu0 %v510_v0  ;;  %271 = vmatprep.mubr.bf16.mxu1 %v510_v0  ;;  %v395_v2 = vld [vmem:[#allocation5 + $0xc] ss:$16 sps:$4 sm:$0xff]   ;;  %v397_v3 = vld [vmem:[#allocation5] ss:$16 sps:$4 sm:$0xff]   ;;  %v398_v4 = vld [vmem:[#allocation5 + $0x8] ss:$16 sps:$4 sm:$0xff]  }
  0x39   :  { %166 = vmatprep.subr.bf16.mxu0 %v393_v1  ;;  %239 = vmatprep.subr.bf16.mxu1 %v395_v2  ;;  %v399_v5 = vld [vmem:[#allocation5 + $0x24] ss:$16 sps:$4 sm:$0xff]   ;;  %v401_v6 = vld [vmem:[#allocation5 + $0x2c] ss:$16 sps:$4 sm:$0xff]   ;;  %v403_v7 = vld [vmem:[#allocation5 + $0x20] ss:$16 sps:$4 sm:$0xff]  }
  0x3a   :  { %167 = vmatpush1.bf16.msra.mxu0 %v397_v3  ;;  %240 = vmatpush1.bf16.msra.mxu1 %v398_v4  ;;  %v404_v8 = vld [vmem:[#allocation5 + $0x28] ss:$16 sps:$4 sm:$0xff]   ;;  %v405_v9 = vld [vmem:[#allocation2] sm:$0xff]   ;;  %v407_v11 = vld [vmem:[#allocation2 + $0x10] sm:$0xff]   ;;  %v74_v14 = vshrl.u32 %v73_v13, 7  ;;  %s511_s2 = smov [#allocation8]  }
  0x3b   :  { %168 = vmatprep.subr.bf16.mxu0 %v399_v5  ;;  %241 = vmatprep.subr.bf16.mxu1 %v401_v6  ;;  %v406_v10 = vld [vmem:[#allocation2 + $0x8] sm:$0xff]   ;;  %v408_v12 = vld [vmem:[#allocation2 + $0x18] sm:$0xff]   ;;  %v71_v17 = vld [vmem:[#allocation7] sm:$0xf]  ;;  %s349_s23 = sshll.u32 %s511_s2, 4  ;;  %s350_s23 = int_to_ptr.vmem [resolvable:$true] %s349_s23 }
  0x3c   :  { %v75_v15 = vsub.s32 0, %v74_v14  ;;  %v83_v16 = vsub.s32 2, %v74_v14  ;;  %v79_v18 = vsub.s32 1, %v74_v14  ;;  %v87_v19 = vsub.s32 3, %v74_v14  ;;  %s475_s24 = scalar_lea.vmem %s350_s23, 4096  ;;  %p480_p11 = scmp.lt.s32.totalorder %s350_s23, %s350_s23 }
  0x3d   :  { %p476_p10 = scmp.ne.s32.totalorder %s350_s23, %s475_s24  ;;  %p481_p12 = scmp.lt.s32.totalorder %s475_s24, %s475_s24 }
  0x3e   :  { %169 = vmatpush1.bf16.msra.mxu0 %v403_v7  ;;  %242 = vmatpush1.bf16.msra.mxu1 %v404_v8  ;;  %v578_v20 = vrot.slane %v71_v17, %v75_v15  ;;  %v580_v21 = vrot.slane %v71_v17, %v83_v16  ;;  %v582_v22 = vrot.slane %v71_v17, %v79_v18 }
  0x3f   :  { %v584_v23 = vrot.slane %v71_v17, %v87_v19  ;;  %p482_p13 = por %p481_p12, %p480_p11 }
  0x41   :  { %374 = vmatmul.mubr.msk.bf16.vlgmr.msra.gmra.mrb[0].mxu0 %vm153_vm0, %v405_v9  ;;  %378 = vmatmul.mubr.msk.bf16.vlgmr.msra.gmra.mrb[0].mxu1 %vm153_vm0, %v405_v9  ;;  %p483_p0 = pnand %p482_p13, %p476_p10 }
  0x42   :  { %208 = vmatprep.mubr.bf16.mxu0 %v510_v0  ;;  %281 = vmatprep.mubr.bf16.mxu1 %v510_v0 }
  0x49   :  { %375 = vmatmul.mubr.msk.bf16.gmra.mrb[4].mxu0 %vm153_vm0, %v406_v10  ;;  %379 = vmatmul.mubr.msk.bf16.gmra.mrb[4].mxu1 %vm153_vm0, %v406_v10 }
  0x4a   :  { %218 = vmatprep.mubr.bf16.mxu0 %v510_v0  ;;  %291 = vmatprep.mubr.bf16.mxu1 %v510_v0 }
  0x51   :  { %376 = vmatmul.mubr.msk.bf16.gmra.mrb[8].mxu0 %vm153_vm0, %v407_v11  ;;  %380 = vmatmul.mubr.msk.bf16.gmra.mrb[8].mxu1 %vm153_vm0, %v407_v11 }
  0x52   :  { %228 = vmatprep.mubr.bf16.mxu0 %v510_v0  ;;  %301 = vmatprep.mubr.bf16.mxu1 %v510_v0 }
  0x59   :  { %377 = vmatmul.mubr.msk.bf16.gmra.mrb[12].mxu0 %vm153_vm0, %v408_v12  ;;  %381 = vmatmul.mubr.msk.bf16.gmra.mrb[12].mxu1 %vm153_vm0, %v408_v12 }
 0x114   :  { %v200_v24 = vpop.f32.mrb[0].mxu0  ;;  %v273_v25 = vpop.f32.mrb[0].mxu1 }
 0x115   :  { %v201_v26 = vadd.f32 %v200_v24, %v578_v20  ;;  %v274_v27 = vadd.f32 %v273_v25, %v580_v21  ;;  %v202_v28 = vpop.f32.mrb[1].mxu0  ;;  %v275_v29 = vpop.f32.mrb[1].mxu1 }
 0x116   :  { %v203_v30 = vadd.f32 %v202_v28, %v582_v22  ;;  %v276_v31 = vadd.f32 %v275_v29, %v584_v23  ;;  %v204_v32 = vpop.f32.mrb[2].mxu0  ;;  %v277_v33 = vpop.f32.mrb[2].mxu1 }
 0x117   :  { %312 = vst [vmem:[#allocation8] sm:$0xff] %v201_v26  ;;  %314 = vst [vmem:[#allocation8 + $0x10] sm:$0xff] %v274_v27  ;;  %v205_v34 = vadd.f32 %v204_v32, %v578_v20  ;;  %v278_v35 = vadd.f32 %v277_v33, %v580_v21  ;;  %v206_v36 = vpop.f32.mrb[3].mxu0  ;;  %v279_v37 = vpop.f32.mrb[3].mxu1 }
 0x118   :  { %313 = vst [vmem:[#allocation8 + $0x8] sm:$0xff] %v203_v30  ;;  %315 = vst [vmem:[#allocation8 + $0x18] sm:$0xff] %v276_v31  ;;  %v207_v38 = vadd.f32 %v206_v36, %v582_v22  ;;  %v280_v39 = vadd.f32 %v279_v37, %v584_v23 }
 0x119   :  { %316 = vst [vmem:[#allocation8 + $0x20] sm:$0xff] %v205_v34  ;;  %318 = vst [vmem:[#allocation8 + $0x30] sm:$0xff] %v278_v35 }
 0x11a   :  { %317 = vst [vmem:[#allocation8 + $0x28] sm:$0xff] %v207_v38  ;;  %319 = vst [vmem:[#allocation8 + $0x38] sm:$0xff] %v280_v39 }
 0x11c   :  { %v210_v40 = vpop.f32.mrb[4].mxu0  ;;  %v283_v41 = vpop.f32.mrb[4].mxu1 }
 0x11d   :  { %v211_v42 = vadd.f32 %v210_v40, %v578_v20  ;;  %v284_v43 = vadd.f32 %v283_v41, %v580_v21  ;;  %v212_v44 = vpop.f32.mrb[5].mxu0  ;;  %v285_v45 = vpop.f32.mrb[5].mxu1 }
 0x11e   :  { %v213_v46 = vadd.f32 %v212_v44, %v582_v22  ;;  %v286_v47 = vadd.f32 %v285_v45, %v584_v23  ;;  %v214_v48 = vpop.f32.mrb[6].mxu0  ;;  %v287_v49 = vpop.f32.mrb[6].mxu1 }
 0x11f   :  { %320 = vst [vmem:[#allocation8 + $0x40] sm:$0xff] %v211_v42  ;;  %322 = vst [vmem:[#allocation8 + $0x50] sm:$0xff] %v284_v43  ;;  %v215_v50 = vadd.f32 %v214_v48, %v578_v20  ;;  %v288_v51 = vadd.f32 %v287_v49, %v580_v21  ;;  %v216_v52 = vpop.f32.mrb[7].mxu0  ;;  %v289_v53 = vpop.f32.mrb[7].mxu1 }
 0x120   :  { %321 = vst [vmem:[#allocation8 + $0x48] sm:$0xff] %v213_v46  ;;  %323 = vst [vmem:[#allocation8 + $0x58] sm:$0xff] %v286_v47  ;;  %v217_v54 = vadd.f32 %v216_v52, %v582_v22  ;;  %v290_v55 = vadd.f32 %v289_v53, %v584_v23 }
 0x121   :  { %324 = vst [vmem:[#allocation8 + $0x60] sm:$0xff] %v215_v50  ;;  %326 = vst [vmem:[#allocation8 + $0x70] sm:$0xff] %v288_v51 }
 0x122   :  { %325 = vst [vmem:[#allocation8 + $0x68] sm:$0xff] %v217_v54  ;;  %327 = vst [vmem:[#allocation8 + $0x78] sm:$0xff] %v290_v55 }
 0x124   :  { %v220_v56 = vpop.f32.mrb[8].mxu0  ;;  %v293_v57 = vpop.f32.mrb[8].mxu1 }
 0x125   :  { %v221_v58 = vadd.f32 %v220_v56, %v578_v20  ;;  %v294_v59 = vadd.f32 %v293_v57, %v580_v21  ;;  %v222_v60 = vpop.f32.mrb[9].mxu0  ;;  %v295_v61 = vpop.f32.mrb[9].mxu1 }
 0x126   :  { %v223_v62 = vadd.f32 %v222_v60, %v582_v22  ;;  %v296_v63 = vadd.f32 %v295_v61, %v584_v23  ;;  %v224_v0 = vpop.f32.mrb[10].mxu0  ;;  %v297_v1 = vpop.f32.mrb[10].mxu1 }
 0x127   :  { %328 = vst [vmem:[#allocation8 + $0x80] sm:$0xff] %v221_v58  ;;  %330 = vst [vmem:[#allocation8 + $0x90] sm:$0xff] %v294_v59  ;;  %v225_v2 = vadd.f32 %v224_v0, %v578_v20  ;;  %v298_v3 = vadd.f32 %v297_v1, %v580_v21  ;;  %v226_v4 = vpop.f32.mrb[11].mxu0  ;;  %v299_v5 = vpop.f32.mrb[11].mxu1 }
 0x128   :  { %329 = vst [vmem:[#allocation8 + $0x88] sm:$0xff] %v223_v62  ;;  %331 = vst [vmem:[#allocation8 + $0x98] sm:$0xff] %v296_v63  ;;  %v227_v6 = vadd.f32 %v226_v4, %v582_v22  ;;  %v300_v7 = vadd.f32 %v299_v5, %v584_v23 }
 0x129   :  { %332 = vst [vmem:[#allocation8 + $0xa0] sm:$0xff] %v225_v2  ;;  %334 = vst [vmem:[#allocation8 + $0xb0] sm:$0xff] %v298_v3 }
 0x12a   :  { %333 = vst [vmem:[#allocation8 + $0xa8] sm:$0xff] %v227_v6  ;;  %335 = vst [vmem:[#allocation8 + $0xb8] sm:$0xff] %v300_v7 }
 0x12c   :  { %v230_v8 = vpop.f32.mrb[12].mxu0  ;;  %v303_v9 = vpop.f32.mrb[12].mxu1 }
 0x12d   :  { %v231_v10 = vadd.f32 %v230_v8, %v578_v20  ;;  %v304_v11 = vadd.f32 %v303_v9, %v580_v21  ;;  %v232_v12 = vpop.f32.mrb[13].mxu0  ;;  %v305_v13 = vpop.f32.mrb[13].mxu1 }
 0x12e   :  { %v233_v14 = vadd.f32 %v232_v12, %v582_v22  ;;  %v306_v15 = vadd.f32 %v305_v13, %v584_v23  ;;  %v234_v16 = vpop.f32.mrb[14].mxu0  ;;  %v307_v17 = vpop.f32.mrb[14].mxu1 }
 0x12f   :  { %336 = vst [vmem:[#allocation8 + $0xc0] sm:$0xff] %v231_v10  ;;  %338 = vst [vmem:[#allocation8 + $0xd0] sm:$0xff] %v304_v11  ;;  %v235_v18 = vadd.f32 %v234_v16, %v578_v20  ;;  %v308_v19 = vadd.f32 %v307_v17, %v580_v21  ;;  %v236_v24 = vpop.f32.mrb[15].mxu0  ;;  %v309_v25 = vpop.f32.mrb[15].mxu1 }
 0x130   :  { %337 = vst [vmem:[#allocation8 + $0xc8] sm:$0xff] %v233_v14  ;;  %339 = vst [vmem:[#allocation8 + $0xd8] sm:$0xff] %v306_v15  ;;  %v237_v26 = vadd.f32 %v236_v24, %v582_v22  ;;  %v310_v27 = vadd.f32 %v309_v25, %v584_v23 }
 0x131   :  { %340 = vst [vmem:[#allocation8 + $0xe0] sm:$0xff] %v235_v18  ;;  %342 = vst [vmem:[#allocation8 + $0xf0] sm:$0xff] %v308_v19 }
 0x132   :  { %341 = vst [vmem:[#allocation8 + $0xe8] sm:$0xff] %v237_v26  ;;  %343 = vst [vmem:[#allocation8 + $0xf8] sm:$0xff] %v310_v27 }
 0x133   :  { %486 = shalt.err (!%p483_p0)
}
 0x134   :  { %s487_s27 = scalar_lea.hbm %s633_s3, 4096 }
 0x135   :  { %p488_p1 = scmp.ne.s32.totalorder %s633_s3, %s487_s27  ;;  %p491_p2 = scmp.lt.u32.totalorder %s487_s27, %s633_s3 }
 0x137   :  { %p493_p3 = pnand %p491_p2, %p488_p1 }
 0x139   :  { %496 = shalt.err (!%p493_p3)
}
 0x13a   :  { %s512_s5 = smov 512   ;;  %s513_s6 = smov 32  }
 0x13b   :  { %355 = dma.vmem_to_hbm [thread:$0]  %s350_s23, 4096, %s633_s3, [#allocation4], %s512_s5, %s512_s5, %s513_s6  }
 0x13c   :  { %501 = dma.done.wait [#allocation4], 4096  }
 0x13d   :  { %502 = vsyncadd [#allocation4], 4294963200 }
 0x13e   :  { %359 = vsyncpa [#allocation3], 1 }
 0x13f   :  { %360 = vsyncpa [#allocation6], 1 }
 0x140   :  { %361 = vsyncpa [#allocation4], 1 }

</bundles_post_ra>
